<compile_context>
chip_gen: v7x
topology: tpu7x:2x2x1
jax: 0.10.0
libtpu: 0.0.40
codegen_flags: <defaults>
</compile_context>

<pallas_src>
import functools

import jax
import jax.numpy as jnp
from jax.experimental import pallas as pl
from jax.experimental.pallas import tpu as pltpu


def _msa_kernel(xc_ref, xr_ref, wc_ref, wr_ref, o_ref, *,
                num_heads, dim, seq_len, block_b, compute_dtype):
    """One batch block per grid step.

    xc_ref, xr_ref : (block_b*N, C)  flattened cls / reg features (f32)
    wc_ref         : (C, 3C)         cls qkv weight (pre-transposed, compute dtype)
    wr_ref         : (C, 2C)         reg q/k weight (v_reg is never used)
    o_ref          : (block_b*N, C)  trans_cls output
    """
    C = dim
    H = num_heads
    D = C // H
    N = seq_len
    Bb = block_b
    cdt = compute_dtype
    f32 = jnp.float32

    xc = xc_ref[...]                                   # (Bb*N, C) f32 (kept for residual)
    xr = xr_ref[...]

    # One projection matmul per stream for the whole batch block (MXU,
    # compute-dtype operands, f32 accumulation).  v_reg projection skipped.
    qkv_c = jnp.dot(xc.astype(cdt), wc_ref[...],
                    preferred_element_type=f32)        # (Bb*N, 3C)
    qk_r = jnp.dot(xr.astype(cdt), wr_ref[...],
                   preferred_element_type=f32)         # (Bb*N, 2C)

    # Attention per batch row (static loop; Bb is small).  All per-head
    # matmuls inside are batched over the head dimension.
    for b in range(Bb):
        r0 = b * N
        qkv_c_b = qkv_c[r0:r0 + N]                     # (N, 3C)
        qk_r_b = qk_r[r0:r0 + N]                       # (N, 2C)

        # Stack cls and reg q/k heads into a single 2H-deep batch so ONE
        # batched contraction produces every score matrix.
        q = jnp.stack(
            [qkv_c_b[:, h * D:(h + 1) * D] for h in range(H)]
            + [qk_r_b[:, h * D:(h + 1) * D] for h in range(H)],
            axis=0)                                    # (2H, N, D)
        k = jnp.stack(
            [qkv_c_b[:, C + h * D:C + (h + 1) * D] for h in range(H)]
            + [qk_r_b[:, C + h * D:C + (h + 1) * D] for h in range(H)],
            axis=0)                                    # (2H, N, D)
        v = jnp.stack(
            [qkv_c_b[:, 2 * C + h * D:2 * C + (h + 1) * D] for h in range(H)],
            axis=0)                                    # (H, N, D)

        # l2-normalize per head row (matches torch.norm, no eps); rsqrt -> EUP.
        q = q * jax.lax.rsqrt(jnp.sum(q * q, axis=-1, keepdims=True))
        k = k * jax.lax.rsqrt(jnp.sum(k * k, axis=-1, keepdims=True))

        # All 2H (cls + reg) score matrices in one batched MXU contraction.
        scores = jnp.einsum('gnd,gmd->gnm', q.astype(cdt), k.astype(cdt),
                            preferred_element_type=f32)       # (2H, N, N)
        probs = jax.nn.softmax(scores, axis=-1)                # f32
        attn = 0.5 * (probs[:H] + probs[H:])                   # (H, N, N)

        # All H attn @ v_cls products in one batched MXU contraction.
        out = jnp.einsum('gnm,gmd->gnd', attn.astype(cdt), v.astype(cdt),
                         preferred_element_type=f32)           # (H, N, D)

        # Write each head straight into its output columns (no concatenate),
        # fusing the residual add with x_cls.
        for h in range(H):
            c0 = h * D
            o_ref[r0:r0 + N, c0:c0 + D] = (
                out[h] + xc[r0:r0 + N, c0:c0 + D]).astype(o_ref.dtype)


def prepare_msa_weights(w_qkv_cls, w_qkv_reg, compute_dtype=jnp.bfloat16):
    """Hoisted, one-time weight preparation (transpose + cast, drop v_reg)."""
    C = w_qkv_cls.shape[1]
    w_cls = jnp.asarray(w_qkv_cls).T.astype(compute_dtype)            # (C, 3C)
    w_reg = jnp.asarray(w_qkv_reg)[:2 * C].T.astype(compute_dtype)    # (C, 2C)
    return w_cls, w_reg


def msa_yolov_forward(x_cls, x_reg, w_cls, w_reg, num_heads, *,
                      block_b=None, compute_dtype=jnp.bfloat16):
    """Pallas implementation of MSA_yolov.forward (returns trans_cls)."""
    B, N, C = x_cls.shape
    assert C % num_heads == 0
    assert w_cls.shape == (C, 3 * C) and w_reg.shape == (C, 2 * C)

    if block_b is None:
        # Largest divisor of B up to 8, but keep >= 2 grid steps when B >= 2
        # so v7x's second TensorCore gets work at small batch.
        cap = max(1, min(8, B // 2)) if B >= 2 else 1
        block_b = 1
        for cand in range(cap, 0, -1):
            if B % cand == 0:
                block_b = cand
                break
    if N % 8 != 0:
        # keep the second-to-last block dim equal to the full array dim
        block_b = B
    assert B % block_b == 0

    kernel = functools.partial(
        _msa_kernel, num_heads=num_heads, dim=C, seq_len=N,
        block_b=block_b, compute_dtype=compute_dtype)

    xc_flat = x_cls.reshape(B * N, C)
    xr_flat = x_reg.reshape(B * N, C)

    out_flat = pl.pallas_call(
        kernel,
        out_shape=jax.ShapeDtypeStruct((B * N, C), x_cls.dtype),
        grid=(B // block_b,),
        in_specs=[
            pl.BlockSpec((block_b * N, C), lambda b: (b, 0)),
            pl.BlockSpec((block_b * N, C), lambda b: (b, 0)),
            pl.BlockSpec((C, 3 * C), lambda b: (0, 0)),
            pl.BlockSpec((C, 2 * C), lambda b: (0, 0)),
        ],
        out_specs=pl.BlockSpec((block_b * N, C), lambda b: (b, 0)),
        compiler_params=pltpu.CompilerParams(
            dimension_semantics=("parallel",),
            vmem_limit_bytes=32 * 1024 * 1024,
        ),
    )(xc_flat, xr_flat, w_cls, w_reg)
    return out_flat.reshape(B, N, C)


def msa_yolov_reference(x_cls, x_reg, w_qkv_cls, w_qkv_reg, num_heads):
    """Plain-JAX transcription of the PyTorch forward (correctness check)."""
    B, N, C = x_cls.shape
    H = num_heads
    D = C // H

    def qkv(x, w):
        # nn.Linear: x @ W^T, then reshape(B,N,3,H,D).permute(2,0,3,1,4)
        y = jnp.einsum('bnc,oc->bno', x, w)
        return y.reshape(B, N, 3, H, D).transpose(2, 0, 3, 1, 4)  # (3,B,H,N,D)

    qkv_c = qkv(x_cls, w_qkv_cls)
    qkv_r = qkv(x_reg, w_qkv_reg)
    q_c, k_c, v_c = qkv_c[0], qkv_c[1], qkv_c[2]
    q_r, k_r, _ = qkv_r[0], qkv_r[1], qkv_r[2]

    def norm(x):
        return x / jnp.linalg.norm(x, axis=-1, keepdims=True)

    q_c, k_c, q_r, k_r = norm(q_c), norm(k_c), norm(q_r), norm(k_r)
    attn_cls = jax.nn.softmax(q_c @ jnp.swapaxes(k_c, -2, -1), axis=-1)
    attn_reg = jax.nn.softmax(q_r @ jnp.swapaxes(k_r, -2, -1), axis=-1)
    attn = 0.5 * (attn_cls + attn_reg)                     # (B,H,N,N)
    x = (attn @ v_c).transpose(0, 2, 1, 3).reshape(B, N, C)
    return x + x_cls


if __name__ == "__main__":
    # Small shapes consistent with the module: dim=32, num_heads=4 (default).
    B, N, C = 2, 8, 32
    num_heads = 4

    key = jax.random.PRNGKey(0)
    k1, k2, k3, k4 = jax.random.split(key, 4)

    x_cls = jax.random.normal(k1, (B, N, C), dtype=jnp.float32)
    x_reg = jax.random.normal(k2, (B, N, C), dtype=jnp.float32)

    # nn.Linear(dim, 3*dim, bias=False) weights, deterministic init (±1/sqrt(C))
    bound = 1.0 / (C ** 0.5)
    w_qkv_cls = jax.random.uniform(k3, (3 * C, C), jnp.float32, -bound, bound)
    w_qkv_reg = jax.random.uniform(k4, (3 * C, C), jnp.float32, -bound, bound)
    # TODO(synk): linear1/linear2 and the sim_round2 (ave) branch of MSA_yolov
    # are unused by this forward path (only trans_cls is returned).

    ref = msa_yolov_reference(x_cls, x_reg, w_qkv_cls, w_qkv_reg, num_heads)

    # f32 compute path: tight check against the PyTorch-semantics reference.
    wc32, wr32 = prepare_msa_weights(w_qkv_cls, w_qkv_reg, compute_dtype=jnp.float32)
    out_f32 = msa_yolov_forward(x_cls, x_reg, wc32, wr32, num_heads,
                                compute_dtype=jnp.float32)
    out_f32 = jax.block_until_ready(out_f32)
    assert out_f32.shape == (B, N, C)
    assert jnp.allclose(out_f32, ref, atol=1e-4, rtol=1e-4), "f32 mismatch vs reference"

    # Default bf16-operand MXU path (f32 accumulation): looser tolerance.
    wcbf, wrbf = prepare_msa_weights(w_qkv_cls, w_qkv_reg, compute_dtype=jnp.bfloat16)
    out_bf16 = msa_yolov_forward(x_cls, x_reg, wcbf, wrbf, num_heads,
                                 compute_dtype=jnp.bfloat16)
    out_bf16 = jax.block_until_ready(out_bf16)
    assert out_bf16.shape == (B, N, C)
    assert jnp.allclose(out_bf16, ref, atol=5e-2, rtol=5e-2), "bf16 mismatch vs reference"

    print("KERNEL_OK")
</pallas_src>

<mosaic_0001>
module attributes {stable_mosaic.version = 11 : i64} {
  func.func @_msa_kernel(%arg0: i32, %arg1: memref<8x32xf32, #tpu.memory_space<vmem>>, %arg2: memref<8x32xf32, #tpu.memory_space<vmem>>, %arg3: memref<32x96xf32, #tpu.memory_space<vmem>>, %arg4: memref<32x64xf32, #tpu.memory_space<vmem>>, %arg5: memref<8x32xf32, #tpu.memory_space<vmem>>) attributes {dimension_semantics = [#tpu.dimension_semantics<parallel>], iteration_bounds = array<i64: 2>, scalar_prefetch = 0 : i64, scratch_operands = 0 : i64, tpu.core_type = #tpu.core_type<tc>, window_params = [{transform_indices = @transform_0, window_bounds = array<i64: 8, 32>}, {transform_indices = @transform_1, window_bounds = array<i64: 8, 32>}, {pipeline_mode = #tpu.pipeline_mode<synchronous>, transform_indices = @transform_2, window_bounds = array<i64: 32, 96>}, {pipeline_mode = #tpu.pipeline_mode<synchronous>, transform_indices = @transform_3, window_bounds = array<i64: 32, 64>}, {transform_indices = @transform_4, window_bounds = array<i64: 8, 32>}]} {
    %c0 = arith.constant 0 : index
    %c0_0 = arith.constant 0 : index
    %0 = vector.load %arg1[%c0, %c0_0] : memref<8x32xf32, #tpu.memory_space<vmem>>, vector<8x32xf32>
    %c0_1 = arith.constant 0 : index
    %c0_2 = arith.constant 0 : index
    %1 = vector.load %arg2[%c0_1, %c0_2] : memref<8x32xf32, #tpu.memory_space<vmem>>, vector<8x32xf32>
    %c0_3 = arith.constant 0 : index
    %c0_4 = arith.constant 0 : index
    %2 = vector.load %arg3[%c0_3, %c0_4] : memref<32x96xf32, #tpu.memory_space<vmem>>, vector<32x96xf32>
    %cst = arith.constant dense<0.000000e+00> : vector<8x96xf32>
    %3 = tpu.matmul %0, %2, %cst {dimension_numbers = #tpu.dot_dimension_numbers<[1], [0], [0], [1], [0, 0, 1, 1], [], []>} : vector<8x32xf32>, vector<32x96xf32>, vector<8x96xf32> -> vector<8x96xf32>
    %c0_5 = arith.constant 0 : index
    %c0_6 = arith.constant 0 : index
    %4 = vector.load %arg4[%c0_5, %c0_6] : memref<32x64xf32, #tpu.memory_space<vmem>>, vector<32x64xf32>
    %cst_7 = arith.constant dense<0.000000e+00> : vector<8x64xf32>
    %5 = tpu.matmul %1, %4, %cst_7 {dimension_numbers = #tpu.dot_dimension_numbers<[1], [0], [0], [1], [0, 0, 1, 1], [], []>} : vector<8x32xf32>, vector<32x64xf32>, vector<8x64xf32> -> vector<8x64xf32>
    %6 = vector.extract_strided_slice %3 {offsets = [0, 0], sizes = [8, 8], strides = [1, 1]} : vector<8x96xf32> to vector<8x8xf32>
    %7 = vector.extract_strided_slice %3 {offsets = [0, 8], sizes = [8, 8], strides = [1, 1]} : vector<8x96xf32> to vector<8x8xf32>
    %8 = vector.extract_strided_slice %3 {offsets = [0, 16], sizes = [8, 8], strides = [1, 1]} : vector<8x96xf32> to vector<8x8xf32>
    %9 = vector.extract_strided_slice %3 {offsets = [0, 24], sizes = [8, 8], strides = [1, 1]} : vector<8x96xf32> to vector<8x8xf32>
    %10 = vector.extract_strided_slice %5 {offsets = [0, 0], sizes = [8, 8], strides = [1, 1]} : vector<8x64xf32> to vector<8x8xf32>
    %11 = vector.extract_strided_slice %5 {offsets = [0, 8], sizes = [8, 8], strides = [1, 1]} : vector<8x64xf32> to vector<8x8xf32>
    %12 = vector.extract_strided_slice %5 {offsets = [0, 16], sizes = [8, 8], strides = [1, 1]} : vector<8x64xf32> to vector<8x8xf32>
    %13 = vector.extract_strided_slice %5 {offsets = [0, 24], sizes = [8, 8], strides = [1, 1]} : vector<8x64xf32> to vector<8x8xf32>
    %14 = vector.shape_cast %6 : vector<8x8xf32> to vector<1x8x8xf32>
    %15 = vector.shape_cast %7 : vector<8x8xf32> to vector<1x8x8xf32>
    %16 = vector.shape_cast %8 : vector<8x8xf32> to vector<1x8x8xf32>
    %17 = vector.shape_cast %9 : vector<8x8xf32> to vector<1x8x8xf32>
    %18 = vector.shape_cast %10 : vector<8x8xf32> to vector<1x8x8xf32>
    %19 = vector.shape_cast %11 : vector<8x8xf32> to vector<1x8x8xf32>
    %20 = vector.shape_cast %12 : vector<8x8xf32> to vector<1x8x8xf32>
    %21 = vector.shape_cast %13 : vector<8x8xf32> to vector<1x8x8xf32>
    %22 = tpu.concatenate %14, %15, %16, %17, %18, %19, %20, %21 in 0 : vector<1x8x8xf32>, vector<1x8x8xf32>, vector<1x8x8xf32>, vector<1x8x8xf32>, vector<1x8x8xf32>, vector<1x8x8xf32>, vector<1x8x8xf32>, vector<1x8x8xf32> -> vector<8x8x8xf32>
    %23 = vector.extract_strided_slice %3 {offsets = [0, 32], sizes = [8, 8], strides = [1, 1]} : vector<8x96xf32> to vector<8x8xf32>
    %24 = vector.extract_strided_slice %3 {offsets = [0, 40], sizes = [8, 8], strides = [1, 1]} : vector<8x96xf32> to vector<8x8xf32>
    %25 = vector.extract_strided_slice %3 {offsets = [0, 48], sizes = [8, 8], strides = [1, 1]} : vector<8x96xf32> to vector<8x8xf32>
    %26 = vector.extract_strided_slice %3 {offsets = [0, 56], sizes = [8, 8], strides = [1, 1]} : vector<8x96xf32> to vector<8x8xf32>
    %27 = vector.extract_strided_slice %5 {offsets = [0, 32], sizes = [8, 8], strides = [1, 1]} : vector<8x64xf32> to vector<8x8xf32>
    %28 = vector.extract_strided_slice %5 {offsets = [0, 40], sizes = [8, 8], strides = [1, 1]} : vector<8x64xf32> to vector<8x8xf32>
    %29 = vector.extract_strided_slice %5 {offsets = [0, 48], sizes = [8, 8], strides = [1, 1]} : vector<8x64xf32> to vector<8x8xf32>
    %30 = vector.extract_strided_slice %5 {offsets = [0, 56], sizes = [8, 8], strides = [1, 1]} : vector<8x64xf32> to vector<8x8xf32>
    %31 = vector.shape_cast %23 : vector<8x8xf32> to vector<1x8x8xf32>
    %32 = vector.shape_cast %24 : vector<8x8xf32> to vector<1x8x8xf32>
    %33 = vector.shape_cast %25 : vector<8x8xf32> to vector<1x8x8xf32>
    %34 = vector.shape_cast %26 : vector<8x8xf32> to vector<1x8x8xf32>
    %35 = vector.shape_cast %27 : vector<8x8xf32> to vector<1x8x8xf32>
    %36 = vector.shape_cast %28 : vector<8x8xf32> to vector<1x8x8xf32>
    %37 = vector.shape_cast %29 : vector<8x8xf32> to vector<1x8x8xf32>
    %38 = vector.shape_cast %30 : vector<8x8xf32> to vector<1x8x8xf32>
    %39 = tpu.concatenate %31, %32, %33, %34, %35, %36, %37, %38 in 0 : vector<1x8x8xf32>, vector<1x8x8xf32>, vector<1x8x8xf32>, vector<1x8x8xf32>, vector<1x8x8xf32>, vector<1x8x8xf32>, vector<1x8x8xf32>, vector<1x8x8xf32> -> vector<8x8x8xf32>
    %40 = vector.extract_strided_slice %3 {offsets = [0, 64], sizes = [8, 8], strides = [1, 1]} : vector<8x96xf32> to vector<8x8xf32>
    %41 = vector.extract_strided_slice %3 {offsets = [0, 72], sizes = [8, 8], strides = [1, 1]} : vector<8x96xf32> to vector<8x8xf32>
    %42 = vector.extract_strided_slice %3 {offsets = [0, 80], sizes = [8, 8], strides = [1, 1]} : vector<8x96xf32> to vector<8x8xf32>
    %43 = vector.extract_strided_slice %3 {offsets = [0, 88], sizes = [8, 8], strides = [1, 1]} : vector<8x96xf32> to vector<8x8xf32>
    %44 = vector.shape_cast %40 : vector<8x8xf32> to vector<1x8x8xf32>
    %45 = vector.shape_cast %41 : vector<8x8xf32> to vector<1x8x8xf32>
    %46 = vector.shape_cast %42 : vector<8x8xf32> to vector<1x8x8xf32>
    %47 = vector.shape_cast %43 : vector<8x8xf32> to vector<1x8x8xf32>
    %48 = tpu.concatenate %44, %45, %46, %47 in 0 : vector<1x8x8xf32>, vector<1x8x8xf32>, vector<1x8x8xf32>, vector<1x8x8xf32> -> vector<4x8x8xf32>
    %49 = arith.mulf %22, %22 : vector<8x8x8xf32>
    %cst_8 = arith.constant dense<0.000000e+00> : vector<8x8xf32>
    %50 = vector.multi_reduction <add>, %49, %cst_8 [2] : vector<8x8x8xf32> to vector<8x8xf32>
    %51 = vector.shape_cast %50 : vector<8x8xf32> to vector<8x8x1xf32>
    %52 = math.rsqrt %51 : vector<8x8x1xf32>
    %53 = vector.broadcast %52 : vector<8x8x1xf32> to vector<8x8x8xf32>
    %54 = arith.mulf %22, %53 : vector<8x8x8xf32>
    %55 = arith.mulf %39, %39 : vector<8x8x8xf32>
    %cst_9 = arith.constant dense<0.000000e+00> : vector<8x8xf32>
    %56 = vector.multi_reduction <add>, %55, %cst_9 [2] : vector<8x8x8xf32> to vector<8x8xf32>
    %57 = vector.shape_cast %56 : vector<8x8xf32> to vector<8x8x1xf32>
    %58 = math.rsqrt %57 : vector<8x8x1xf32>
    %59 = vector.broadcast %58 : vector<8x8x1xf32> to vector<8x8x8xf32>
    %60 = arith.mulf %39, %59 : vector<8x8x8xf32>
    "tpu.trace_start"() <{level = 10 : i32, message = "gnd,gmd->gnm"}> : () -> ()
    %cst_10 = arith.constant dense<0.000000e+00> : vector<8x8x8xf32>
    %61 = tpu.matmul %54, %60, %cst_10 {dimension_numbers = #tpu.dot_dimension_numbers<[2], [2], [1], [1], [0, 0, 0, 1, 1, 1], [0], [0]>} : vector<8x8x8xf32>, vector<8x8x8xf32>, vector<8x8x8xf32> -> vector<8x8x8xf32>
    "tpu.trace_stop"() : () -> ()
    %cst_11 = arith.constant dense<0xFF800000> : vector<8x8xf32>
    %62 = vector.multi_reduction <maximumf>, %61, %cst_11 [2] : vector<8x8x8xf32> to vector<8x8xf32>
    %cst_12 = arith.constant 0xFF800000 : f32
    %63 = vector.broadcast %cst_12 : f32 to vector<8x8xf32>
    %64 = arith.maximumf %63, %62 : vector<8x8xf32>
    %65 = vector.shape_cast %64 : vector<8x8xf32> to vector<8x8x1xf32>
    %66 = vector.broadcast %65 : vector<8x8x1xf32> to vector<8x8x8xf32>
    %67 = arith.subf %61, %66 : vector<8x8x8xf32>
    %68 = math.exp %67 : vector<8x8x8xf32>
    %cst_13 = arith.constant dense<0.000000e+00> : vector<8x8xf32>
    %69 = vector.multi_reduction <add>, %68, %cst_13 [2] : vector<8x8x8xf32> to vector<8x8xf32>
    %70 = vector.shape_cast %69 : vector<8x8xf32> to vector<8x8x1xf32>
    %71 = vector.broadcast %70 : vector<8x8x1xf32> to vector<8x8x8xf32>
    %72 = arith.divf %68, %71 : vector<8x8x8xf32>
    %73 = vector.extract_strided_slice %72 {offsets = [0, 0, 0], sizes = [4, 8, 8], strides = [1, 1, 1]} : vector<8x8x8xf32> to vector<4x8x8xf32>
    %74 = vector.extract_strided_slice %72 {offsets = [4, 0, 0], sizes = [4, 8, 8], strides = [1, 1, 1]} : vector<8x8x8xf32> to vector<4x8x8xf32>
    %75 = arith.addf %73, %74 : vector<4x8x8xf32>
    %cst_14 = arith.constant 5.000000e-01 : f32
    %76 = vector.broadcast %cst_14 : f32 to vector<4x8x8xf32>
    %77 = arith.mulf %76, %75 : vector<4x8x8xf32>
    "tpu.trace_start"() <{level = 10 : i32, message = "gnm,gmd->gnd"}> : () -> ()
    %cst_15 = arith.constant dense<0.000000e+00> : vector<4x8x8xf32>
    %78 = tpu.matmul %77, %48, %cst_15 {dimension_numbers = #tpu.dot_dimension_numbers<[2], [1], [1], [2], [0, 0, 0, 1, 1, 2], [0], [0]>} : vector<4x8x8xf32>, vector<4x8x8xf32>, vector<4x8x8xf32> -> vector<4x8x8xf32>
    "tpu.trace_stop"() : () -> ()
    %79 = vector.extract_strided_slice %78 {offsets = [0, 0, 0], sizes = [1, 8, 8], strides = [1, 1, 1]} : vector<4x8x8xf32> to vector<1x8x8xf32>
    %80 = vector.shape_cast %79 : vector<1x8x8xf32> to vector<8x8xf32>
    %81 = vector.extract_strided_slice %0 {offsets = [0, 0], sizes = [8, 8], strides = [1, 1]} : vector<8x32xf32> to vector<8x8xf32>
    %82 = arith.addf %80, %81 : vector<8x8xf32>
    %c0_16 = arith.constant 0 : index
    %c0_17 = arith.constant 0 : index
    %83 = vector.load %arg5[%c0_16, %c0_17] : memref<8x32xf32, #tpu.memory_space<vmem>>, vector<8x8xf32>
    tpu.vector_store %arg5[%c0_16, %c0_17], %82 {strides = array<i32>} : memref<8x32xf32, #tpu.memory_space<vmem>>, vector<8x8xf32>,
    %84 = vector.extract_strided_slice %78 {offsets = [1, 0, 0], sizes = [1, 8, 8], strides = [1, 1, 1]} : vector<4x8x8xf32> to vector<1x8x8xf32>
    %85 = vector.shape_cast %84 : vector<1x8x8xf32> to vector<8x8xf32>
    %86 = vector.extract_strided_slice %0 {offsets = [0, 8], sizes = [8, 8], strides = [1, 1]} : vector<8x32xf32> to vector<8x8xf32>
    %87 = arith.addf %85, %86 : vector<8x8xf32>
    %c0_18 = arith.constant 0 : index
    %c8 = arith.constant 8 : index
    %88 = vector.load %arg5[%c0_18, %c8] : memref<8x32xf32, #tpu.memory_space<vmem>>, vector<8x8xf32>
    tpu.vector_store %arg5[%c0_18, %c8], %87 {strides = array<i32>} : memref<8x32xf32, #tpu.memory_space<vmem>>, vector<8x8xf32>,
    %89 = vector.extract_strided_slice %78 {offsets = [2, 0, 0], sizes = [1, 8, 8], strides = [1, 1, 1]} : vector<4x8x8xf32> to vector<1x8x8xf32>
    %90 = vector.shape_cast %89 : vector<1x8x8xf32> to vector<8x8xf32>
    %91 = vector.extract_strided_slice %0 {offsets = [0, 16], sizes = [8, 8], strides = [1, 1]} : vector<8x32xf32> to vector<8x8xf32>
    %92 = arith.addf %90, %91 : vector<8x8xf32>
    %c0_19 = arith.constant 0 : index
    %c16 = arith.constant 16 : index
    %93 = vector.load %arg5[%c0_19, %c16] : memref<8x32xf32, #tpu.memory_space<vmem>>, vector<8x8xf32>
    tpu.vector_store %arg5[%c0_19, %c16], %92 {strides = array<i32>} : memref<8x32xf32, #tpu.memory_space<vmem>>, vector<8x8xf32>,
    %94 = vector.extract_strided_slice %78 {offsets = [3, 0, 0], sizes = [1, 8, 8], strides = [1, 1, 1]} : vector<4x8x8xf32> to vector<1x8x8xf32>
    %95 = vector.shape_cast %94 : vector<1x8x8xf32> to vector<8x8xf32>
    %96 = vector.extract_strided_slice %0 {offsets = [0, 24], sizes = [8, 8], strides = [1, 1]} : vector<8x32xf32> to vector<8x8xf32>
    %97 = arith.addf %95, %96 : vector<8x8xf32>
    %c0_20 = arith.constant 0 : index
    %c24 = arith.constant 24 : index
    %98 = vector.load %arg5[%c0_20, %c24] : memref<8x32xf32, #tpu.memory_space<vmem>>, vector<8x8xf32>
    tpu.vector_store %arg5[%c0_20, %c24], %97 {strides = array<i32>} : memref<8x32xf32, #tpu.memory_space<vmem>>, vector<8x8xf32>,
    return
  }
  func.func @transform_0(%arg0: i32) -> (i32, i32) {
    %c0_i32 = arith.constant 0 : i32
    %c0_i32_0 = arith.constant 0 : i32
    return %arg0, %c0_i32 : i32, i32
  }
  func.func @transform_1(%arg0: i32) -> (i32, i32) {
    %c0_i32 = arith.constant 0 : i32
    %c0_i32_0 = arith.constant 0 : i32
    return %arg0, %c0_i32 : i32, i32
  }
  func.func @transform_2(%arg0: i32) -> (i32, i32) {
    %c0_i32 = arith.constant 0 : i32
    %c0_i32_0 = arith.constant 0 : i32
    %c0_i32_1 = arith.constant 0 : i32
    return %c0_i32, %c0_i32_0 : i32, i32
  }
  func.func @transform_3(%arg0: i32) -> (i32, i32) {
    %c0_i32 = arith.constant 0 : i32
    %c0_i32_0 = arith.constant 0 : i32
    %c0_i32_1 = arith.constant 0 : i32
    return %c0_i32, %c0_i32_0 : i32, i32
  }
  func.func @transform_4(%arg0: i32) -> (i32, i32) {
    %c0_i32 = arith.constant 0 : i32
    %c0_i32_0 = arith.constant 0 : i32
    return %arg0, %c0_i32 : i32, i32
  }
}

</mosaic_0001>

<bundles_post_ra>
// kernel: tpu_custom_call.1
= control target key start
LH: loop header
LB: loop body
LE: loop exit
PB: predicated region body
PF: predicated region fallthrough
CT: control target
= control target key end

     0   :  { %s2796_s0 = inlined_call_operand.hbm [shape: f32[16,32], index: 0, kind: input, shape index: {}]   ;;  %s2797_s1 = inlined_call_operand.hbm [shape: f32[16,32], index: 1, kind: input, shape index: {}]   ;;  %s2798_s2 = inlined_call_operand.hbm [shape: f32[32,96], index: 2, kind: input, shape index: {}]   ;;  %s2799_s3 = inlined_call_operand.hbm [shape: f32[32,64], index: 3, kind: input, shape index: {}]   ;;  %s2800_s4 = inlined_call_operand.hbm [shape: f32[16,32], index: 4, kind: output, shape index: {}]  }
   0x1   :  { %2805 = sst [smem:[#allocation16_spill]] %s2798_s2 }
   0x2   :  { %9 = vsyncpa [#allocation3], 0 }
   0x3   :  { %11 = vsyncpa [#allocation3 + $0x1], 0 }
   0x4   :  { %12 = vsyncpa [#allocation6], 0 }
   0x5   :  { %14 = vsyncpa [#allocation6 + $0x1], 0 }
   0x6   :  { %15 = vsyncpa [#allocation9], 0 }
   0x7   :  { %16 = vsyncpa [#allocation4], 0 }
   0x8   :  { %18 = vsyncpa [#allocation4 + $0x1], 0  ;;  %s2316_s15 = smov 0   ;;  %s2318_s16 = smov 0  }
   0x9   :  { %s2320_s17 = smov 0   ;;  %s2322_s18 = smov 0  }
   0xa LB: > { %s2337_s19 = sadd.s32 4294967295, %s2271_s18   ;;  %s1759_s20 = sadd.s32 4294967294, %s2271_s18   ;;  %s2271_s18 = sphi %s2322_s18, %s2826_s18   ;;  %s2267_s17 = sphi %s2320_s17, %s2825_s17   ;;  %s2263_s16 = sphi %s2318_s16, %s2824_s16   ;;  %s2259_s15 = sphi %s2316_s15, %s2823_s15  }
   0xb   : > { %p44_p0 = scmp.ne.s32.totalorder %s2263_s16, %s2259_s15  ;;  %p2801_p1 = scmp.eq.s32.totalorder %s2337_s19, 0 }
   0xc   : > { %p142_p3 = scmp.eq.s32.totalorder %s1759_s20, 1  ;;  %p1760_p5 = scmp.ge.s32.totalorder %s2271_s18, 1 }
   0xd   : > { %p2346_p4 = por %p2801_p1, %p44_p0  ;;  %p149_p7 = scmp.lt.s32.totalorder %s2271_s18, 3 }
   0xe   : > { %p2351_p6 = por %p142_p3, %p44_p0  ;;  %s2273_s24 = smov [#allocation7]  }
   0xf   : > { %s2806_s21 = scalar_select %p2346_p4, 1, 0 }
  0x10   : > { %s2807_s22 = scalar_select %p2351_p6, 1, 0 }
  0x11   : > { %p2356_p8 = pnand %p1760_p5, %p149_p7  ;;  %s161_s25 = sshll.u32 %s2273_s24, 4  ;;  %s2360_s25 = int_to_ptr.vmem [resolvable:$true] %s161_s25 }
  0x12   : > { %s2274_s27 = smov [#allocation8]   ;;  %s2810_s2 = sld [smem:[#allocation16_spill]] }
  0x13   : > { %s2808_s23 = scalar_select %p2356_p8, 1, 0 }
  0x14   : > { %p1942_p9 = pneg %p2356_p8  ;;  %s174_s28 = sshll.u32 %s2274_s27, 4  ;;  %s2371_s28 = int_to_ptr.vmem [resolvable:$true] %s174_s28 }
  0x16   : > { %p2367_p11 = pnand %p1942_p9, %p2801_p1 }
  0x18   : > { %s2077_s5 = scalar_lea.hbm %s2810_s2, 512  ;;  %p2079_p13 = pneg %p2367_p11 }
  0x19   : > { %p2078_p12 = scmp.ne.s32.totalorder %s2810_s2, %s2077_s5  ;;  %p2084_p5 = scmp.lt.u32.totalorder %s2077_s5, %s2810_s2 }
  0x1b   : > { %p2080_p0 = pnand %p2079_p13, %p2078_p12 }
  0x1d   : > { %p2081_p3 = pneg %p2080_p0 }
  0x1f   : > { %p2086_p7 = pnand %p2084_p5, %p2081_p3 }
  0x21   : > { %2089 = shalt.err (!%p2086_p7)
}
  0x22   : > { %s2090_s10 = scalar_lea.vmem %s2360_s25, 512  ;;  %p2098_p2 = scmp.lt.s32.totalorder %s2360_s25, %s2360_s25 }
  0x23   : > { %p2091_p9 = scmp.ne.s32.totalorder %s2360_s25, %s2090_s10  ;;  %p2099_p12 = scmp.lt.s32.totalorder %s2090_s10, %s2090_s10 }
  0x25   : > { %p2093_p10 = pnand %p2091_p9, %p2079_p13  ;;  %p2100_p0 = por %p2099_p12, %p2098_p2 }
  0x27   : > { %p2094_p1 = pneg %p2093_p10 }
  0x29   : > { %p2101_p6 = pnand %p2100_p0, %p2094_p1 }
  0x2b   : > { %2104 = shalt.err (!%p2101_p6)
}
  0x2c   : > { %s2275_s11 = smov 128   ;;  %s2276_s12 = smov 8  }
  0x2d   : > { %1945 = dma.hbm_to_vmem [thread:$0]  (!%p2367_p11), %s2810_s2, 512, %s2360_s25, [#allocation6], %s2275_s11, %s2275_s11, %s2276_s12  }
  0x2e   : > { %s2105_s27 = scalar_lea.hbm %s2799_s3, 512 }
  0x2f   : > { %p2106_p2 = scmp.ne.s32.totalorder %s2799_s3, %s2105_s27  ;;  %p2112_p10 = scmp.lt.u32.totalorder %s2105_s27, %s2799_s3 }
  0x31   : > { %p2108_p1 = pnand %p2106_p2, %p2079_p13 }
  0x33   : > { %p2109_p6 = pneg %p2108_p1 }
  0x35   : > { %p2114_p3 = pnand %p2112_p10, %p2109_p6 }
  0x37   : > { %2117 = shalt.err (!%p2114_p3)
}
  0x38   : > { %s2118_s25 = scalar_lea.vmem %s2371_s28, 512  ;;  %p2126_p12 = scmp.lt.s32.totalorder %s2371_s28, %s2371_s28 }
  0x39   : > { %p2119_p5 = scmp.ne.s32.totalorder %s2371_s28, %s2118_s25  ;;  %p2127_p0 = scmp.lt.s32.totalorder %s2118_s25, %s2118_s25 }
  0x3b   : > { %p2121_p7 = pnand %p2119_p5, %p2079_p13  ;;  %p2128_p2 = por %p2127_p0, %p2126_p12 }
  0x3d   : > { %p2122_p9 = pneg %p2121_p7 }
  0x3f   : > { %p2129_p1 = pnand %p2128_p2, %p2122_p9 }
  0x41   : > { %2132 = shalt.err (!%p2129_p1)
}
  0x42   : > { %1948 = dma.hbm_to_vmem [thread:$0]  (!%p2367_p11), %s2799_s3, 512, %s2371_s28, [#allocation9], %s2275_s11, %s2275_s11, %s2276_s12  }
  0x43   : > { %s2426_s9 = sadd.s32 1, %s2271_s18   ;;  %s31_s26 = sadd.s32 1, %s2267_s17 }
  0x44   : > { %s28_s10 = ssub.s32 %s2271_s18, %s2426_s9  ;;  %p38_p13 = scmp.ne.s32.totalorder %s2267_s17, %s2263_s16 }
  0x45   : > { %p29_p6 = scmp.eq.s32.totalorder %s28_s10, 0  ;;  %p39_p10 = scmp.eq.s32.totalorder %s2271_s18, 0 }
  0x46   : > { %p2811_p3 = scmp.eq.s32.totalorder %s2337_s19, 1  ;;  %p1962_p7 = scmp.lt.s32.totalorder %s2271_s18, 2 }
  0x47   : > { %s2442_s14 = scalar_select %p29_p6, %s2267_s17, %s31_s26  }
  0x48   : > { %p2436_p5 = por %p2811_p3, %p38_p13  ;;  %p40_p9 = por %p39_p10, %p38_p13 }
  0x49   : > { %s188_s20 = sand.u32 1, %s2267_s17   ;;  %s1765_s11 = sshll.u32 %s2271_s18, 7 }
  0x4a   : > { %s2812_s13 = scalar_select %p2436_p5, 1, 0 }
  0x4b   : > { %s2445_s28 = sshll.u32 %s188_s20, 3  ;;  %s2451_s27 = scalar_lea.hbm %s2796_s0, %s1765_s11 }
  0x4c   : > { %s192_s29 = scalar_lea.vmem [#allocation2], %s2445_s28  ;;  %p2456_p11 = pnand %p1962_p7, %p40_p9 }
  0x4d   : > { %s199_s30 = sshll.u32 %s192_s29, 4  ;;  %s2463_s7 = scalar_lea.hbm %s2797_s1, %s1765_s11  ;;  %s2454_s30 = int_to_ptr.vmem [resolvable:$true] %s199_s30 }
  0x4e   : > { %s206_s8 = sand.u32 1, %s2271_s18   ;;  %s189_s26 = scalar_lea.sflag [#allocation3], %s188_s20 }
  0x4f   : > { %s2133_s10 = scalar_lea.hbm %s2451_s27, 128  ;;  %p2135_p0 = pneg %p2456_p11 }
  0x50   : > { %p2134_p12 = scmp.ne.s32.totalorder %s2451_s27, %s2133_s10  ;;  %s2138_s29 = scalar_lea.hbm %s2796_s0, 256 }
  0x51   : > { %p2139_p13 = scmp.lt.u32.totalorder %s2451_s27, %s2796_s0  ;;  %p2140_p6 = scmp.lt.u32.totalorder %s2138_s29, %s2133_s10 }
  0x52   : > { %p2136_p2 = pnand %p2135_p0, %p2134_p12  ;;  %p2142_p3 = scmp.lt.u32.totalorder %s2133_s10, %s2451_s27 }
  0x53   : > { %p2141_p10 = por %p2140_p6, %p2139_p13 }
  0x54   : > { %p2137_p1 = pneg %p2136_p2 }
  0x55   : > { %p2143_p7 = por %p2142_p3, %p2141_p10 }
  0x57   : > { %p2144_p9 = pnand %p2143_p7, %p2137_p1 }
  0x59   : > { %2147 = shalt.err (!%p2144_p9)
}
  0x5a   : > { %s2148_s20 = scalar_lea.vmem %s2454_s30, 128  ;;  %s2277_s11 = smov [#allocation2]  }
  0x5b   : > { %p2149_p12 = scmp.ne.s32.totalorder %s2454_s30, %s2148_s20  ;;  %s2153_s25 = sshll.u32 %s2277_s11, 4  ;;  %s2154_s25 = int_to_ptr.vmem [resolvable:$false] %s2153_s25 }
  0x5c   : > { %s2155_s2 = scalar_lea.vmem %s2154_s25, 256  ;;  %p2156_p4 = scmp.lt.s32.totalorder %s2454_s30, %s2154_s25 }
  0x5d   : > { %p2151_p2 = pnand %p2149_p12, %p2135_p0  ;;  %p2157_p13 = scmp.lt.s32.totalorder %s2155_s2, %s2148_s20 }
  0x5f   : > { %p2152_p5 = pneg %p2151_p2  ;;  %p2158_p6 = por %p2157_p13, %p2156_p4 }
  0x61   : > { %p2159_p10 = pnand %p2158_p6, %p2152_p5 }
  0x63   : > { %2162 = shalt.err (!%p2159_p10)
}
  0x64   : > { %1952 = dma.hbm_to_vmem [thread:$0]  (!%p2456_p11), %s2451_s27, 128, %s2454_s30, %s189_s26  }
  0x65   : > { %s210_s10 = scalar_lea.vmem [#allocation5], %s2445_s28  ;;  %s207_s24 = scalar_lea.sflag [#allocation6], %s206_s8 }
  0x66   : > { %s217_s12 = sshll.u32 %s210_s10, 4  ;;  %s2163_s29 = scalar_lea.hbm %s2463_s7, 128  ;;  %s218_s12 = int_to_ptr.vmem [resolvable:$true] %s217_s12 }
  0x67   : > { %p2164_p4 = scmp.ne.s32.totalorder %s2463_s7, %s2163_s29  ;;  %s2168_s11 = scalar_lea.hbm %s2797_s1, 256 }
  0x68   : > { %p2169_p3 = scmp.lt.u32.totalorder %s2463_s7, %s2797_s1  ;;  %p2170_p7 = scmp.lt.u32.totalorder %s2168_s11, %s2163_s29 }
  0x69   : > { %p2166_p5 = pnand %p2164_p4, %p2135_p0  ;;  %p2172_p12 = scmp.lt.u32.totalorder %s2163_s29, %s2463_s7 }
  0x6a   : > { %p2171_p9 = por %p2170_p7, %p2169_p3 }
  0x6b   : > { %p2167_p1 = pneg %p2166_p5 }
  0x6c   : > { %p2173_p2 = por %p2172_p12, %p2171_p9 }
  0x6e   : > { %p2174_p13 = pnand %p2173_p2, %p2167_p1 }
  0x70   : > { %2177 = shalt.err (!%p2174_p13)
}
  0x71   : > { %s2178_s28 = scalar_lea.vmem %s218_s12, 128  ;;  %s2278_s27 = smov [#allocation5]  }
  0x72   : > { %p2179_p6 = scmp.ne.s32.totalorder %s218_s12, %s2178_s28  ;;  %s2183_s30 = sshll.u32 %s2278_s27, 4  ;;  %s2184_s30 = int_to_ptr.vmem [resolvable:$false] %s2183_s30 }
  0x73   : > { %s2185_s8 = scalar_lea.vmem %s2184_s30, 256  ;;  %p2186_p5 = scmp.lt.s32.totalorder %s218_s12, %s2184_s30 }
  0x74   : > { %p2181_p10 = pnand %p2179_p6, %p2135_p0  ;;  %p2187_p8 = scmp.lt.s32.totalorder %s2185_s8, %s2178_s28 }
  0x76   : > { %p2182_p4 = pneg %p2181_p10  ;;  %p2188_p3 = por %p2187_p8, %p2186_p5 }
  0x78   : > { %p2189_p7 = pnand %p2188_p3, %p2182_p4 }
  0x7a   : > { %2192 = shalt.err (!%p2189_p7)
}
  0x7b   : > { %1955 = dma.hbm_to_vmem [thread:$0]  (!%p2456_p11), %s2463_s7, 128, %s218_s12, %s207_s24  }
  0x7c   : > { %p2814_p1 = scmp.ne.s32.totalorder %s2808_s23, 0 }
  0x7d   : > { %s2516_s26 = sand.u32 (!%p2814_p1), 1, %s2263_s16   ;;  %p2815_p8 = scmp.ne.s32.totalorder (!%p2814_p1), %s2806_s21, 0 }
  0x7e   : > { %226 = sbr.rel (%p2814_p1) target bundleno = 1767 (0x6e7), region = 36  ;;  %s2519_s10 = sshll.u32 (!%p2814_p1), %s2516_s26, 3 }
  0x7f   : > { %s229_s29 = scalar_lea.sflag (!%p2814_p1), [#allocation3], %s2516_s26  ;;  %s232_s6 = scalar_lea.vmem (!%p2814_p1), [#allocation2], %s2519_s10 }
  0x85   : > { %2238 = dma.done.wait (%p2815_p8), %s229_s29, 128  }
  0x86   : > { %2240 = vsyncadd (%p2815_p8), %s229_s29, 4294967168  ;;  %s237_s23 = sand.u32 1, %s2337_s19   ;;  %s241_s7 = scalar_lea.vmem [#allocation5], %s2519_s10 }
  0x87   : > { %s238_s5 = scalar_lea.sflag [#allocation6], %s237_s23 }
  0x88   : > { %2242 = dma.done.wait (%p2815_p8), %s238_s5, 128  }
  0x89   : > { %2244 = vsyncadd (%p2815_p8), %s238_s5, 4294967168  ;;  %p2816_p11 = scmp.eq.s32.totalorder %s2337_s19, 0 }
  0x8b   : > { %2246 = dma.done.wait (%p2816_p11), [#allocation6], 512   ;;  %p2817_p0 = pmov %p2816_p11 }
  0x8d   : > { %2248 = vsyncadd (%p2817_p0), [#allocation6], 4294966784  ;;  %p2818_p9 = pmov %p2817_p0 }
  0x8e   : > { %p2819_p12 = pmov %p2817_p0 }
  0x8f   : > { %2250 = dma.done.wait (%p2818_p9), [#allocation9], 512  }
  0x90   : > { %2252 = vsyncadd (%p2819_p12), [#allocation9], 4294966784  ;;  %v2279_v0 = vmov 0.0|0.0   ;;  %vm2280_vm0 = vmmov 0   ;;  %v2281_v1 = vmov 0.0   ;;  %v281_v2 = vld [vmem:[#allocation7] sm:$0xff] }
  0x91   : > { %1916 = vmatprep.subr.bf16.mxu0 %v2279_v0  ;;  %1842 = vmatprep.mubr.msk.f32.mxu0 %vm2280_vm0, %v2281_v1  ;;  %v282_v3 = vld [vmem:[#allocation7 + $0x8] sm:$0xff]  ;;  %v283_v4 = vld [vmem:[#allocation7 + $0x10] sm:$0xff]  ;;  %v284_v6 = vld [vmem:[#allocation7 + $0x18] sm:$0xff]  ;;  %vm285_vm1 = vcmask 261120   ;;  %s2282_s21 = smov 104   ;;  %s2283_s12 = smov 120  }
  0x92   : > { %1922 = vmatprep.subr.bf16.mxu1 %v2279_v0  ;;  %1853 = vmatprep.mubr.msk.f32.mxu1 %vm2280_vm0, %v2281_v1  ;;  %v1917_v5 = vpack.c.bf16 %v282_v3, %v281_v2  ;;  %v359_v7 = vld [vmem:[#allocation8] sm:$0xff]  ;;  %v360_v8 = vld [vmem:[#allocation8 + $0x8] sm:$0xff]  ;;  %v361_v9 = vld [vmem:[#allocation8 + $0x10] sm:$0xff]  ;;  %v1920_v11 = vpack.c.bf16 %v284_v6, %v283_v4  ;;  %s2284_s24 = smov 112   ;;  %s2285_s20 = smov 96   ;;  %vm464_vm2 = vcmask 64512  }
  0x93   : > { %v362_v10 = vld [vmem:[#allocation8 + $0x18] sm:$0xff]  ;;  %v1923_v12 = vpack.c.bf16 %v360_v8, %v359_v7  ;;  %v2547_v14 = vld [vmem:[%s232_s6] sm:$0xff]  ;;  %s2286_s11 = smov 64   ;;  %s2740_s25 = scalar_lea.vmem [#allocation10], %s2519_s10  ;;  %vm1611_vm3 = vcmask 130112   ;;  %vm1621_vm4 = vcmask 195712  }
  0x94   : > { %1918 = vmatpush3.bf16.msra.mxu0 %v1917_v5  ;;  %v1926_v13 = vpack.c.bf16 %v362_v10, %v361_v9  ;;  %v280_v15 = vld [vmem:[%s241_s7] sm:$0xff]  ;;  %s2287_s2 = smov 8   ;;  %s2288_s28 = smov 16   ;;  %vm1631_vm5 = vcmask 261312  }
  0x95   : > { %1919 = vmatprep.subr.bf16.mxu0 %v2279_v0  ;;  %1924 = vmatpush3.bf16.msra.mxu1 %v1923_v12  ;;  %s2289_s27 = smov 24   ;;  %s1797_s30 = sshll.u32 %s2337_s19, 7 }
  0x96   : > { %1925 = vmatprep.subr.bf16.mxu1 %v2279_v0  ;;  %s1647_s8 = sshll.u32 %s2740_s25, 4  ;;  %s2751_s6 = scalar_lea.hbm %s2800_s4, %s1797_s30  ;;  %s2753_s8 = int_to_ptr.vmem [resolvable:$true] %s1647_s8 }
  0x97   : > { %s1634_s23 = scalar_lea.sflag [#allocation4], %s2516_s26  ;;  %s2193_s5 = scalar_lea.vmem %s2753_s8, 128 }
  0x98   : > { %1921 = vmatpush3.bf16.msra.mxu0 %v1920_v11  ;;  %p2194_p2 = scmp.ne.s32.totalorder %s2753_s8, %s2193_s5  ;;  %p2820_p13 = scmp.ne.s32.totalorder %s2812_s13, 0 }
  0x99   : > { %1856 = vmatprep.subr.mxu0 %v2281_v1  ;;  %1927 = vmatpush3.bf16.msra.mxu1 %v1926_v13  ;;  %s2290_s19 = smov [#allocation10]  }
  0x9a   : > { %1861 = vmatprep.subr.mxu1 %v2281_v1  ;;  %p2195_p6 = pnand %p2194_p2, %p2820_p13  ;;  %s2197_s7 = sshll.u32 %s2290_s19, 4  ;;  %s2198_s7 = int_to_ptr.vmem [resolvable:$false] %s2197_s7 }
  0x9b   : > { %1843 = vmatmul.mubr.msk.f32.vlgmr.msra.gmra.mrb[0].mxu0 %vm285_vm1, %v2547_v14  ;;  %p2200_p4 = scmp.lt.s32.totalorder %s2753_s8, %s2198_s7 }
  0x9c   : > { %1858 = vmatprep.mubr.msk.f32.mxu0 %vm2280_vm0, %v2281_v1  ;;  %1854 = vmatmul.mubr.msk.f32.vlgmr.msra.gmra.mrb[0].mxu1 %vm285_vm1, %v280_v15  ;;  %p2196_p10 = pneg %p2195_p6 }
  0x9d   : > { %1863 = vmatprep.mubr.msk.f32.mxu1 %vm2280_vm0, %v2281_v1 }
 0x16e   : > { %v2558_v16 = vpop.f32.mrb[0].mxu0 }
 0x16f   : > { %443 = vrot.lane.b32.xlu1 %v2558_v16, %s2282_s21  ;;  %437 = vrot.lane.b32.xlu0 %v2558_v16, %s2283_s12  ;;  %v1844_v17 = vpop.f32.mrb[1].mxu0  ;;  %v2564_v18 = vpop.f32.mrb[0].mxu1  ;;  %v456_v20 = vmul.f32 %v2558_v16, %v2558_v16 }
 0x170   : > { %v1855_v19 = vpop.f32.mrb[1].mxu1  ;;  %v460_v30 = vmul.f32 %v2564_v18, %v2564_v18 }
 0x171   : > { %v465_v50 = vsel %vm464_vm2, %v456_v20, 0.0 }
 0x172   : > { %v477_v54 = vsel %vm464_vm2, %v460_v30, 0.0 }
 0x173   : > { %440 = vrot.lane.b32.xlu0 %v2558_v16, %s2284_s24  ;;  %447 = vrot.lane.b32.xlu1 %v2564_v18, %s2283_s12 }
 0x177   : > { %450 = vrot.lane.b32.xlu0 %v2564_v18, %s2284_s24  ;;  %453 = vrot.lane.b32.xlu1 %v2564_v18, %s2282_s21 }
 0x17b   : > { %513 = vrot.lane.b32.xlu0 %v456_v20, %s2285_s20 }
 0x1e1   : > { %v2577_v21 = vpop.permute.xlu1 %443  ;;  %v2579_v22 = vpop.permute.xlu0 %437 }
 0x1e2   : > { %v457_v23 = vmul.f32 %v2579_v22, %v2579_v22  ;;  %v459_v26 = vmul.f32 %v2577_v21, %v2577_v21 }
 0x1e4   : > { %515 = vrot.lane.b32.xlu1 %v457_v23, %s2285_s20  ;;  %v468_v51 = vsel %vm464_vm2, %v457_v23, 0.0  ;;  %v474_v53 = vsel %vm464_vm2, %v459_v26, 0.0 }
 0x1e5   : > { %v2584_v24 = vpop.permute.xlu0 %440  ;;  %v2586_v25 = vpop.permute.xlu1 %447 }
 0x1e6   : > { %v458_v27 = vmul.f32 %v2584_v24, %v2584_v24  ;;  %v461_v28 = vmul.f32 %v2586_v25, %v2586_v25 }
 0x1e8   : > { %519 = vrot.lane.b32.xlu1 %v459_v26, %s2285_s20  ;;  %517 = vrot.lane.b32.xlu0 %v458_v27, %s2285_s20  ;;  %v471_v52 = vsel %vm464_vm2, %v458_v27, 0.0  ;;  %v480_v55 = vsel %vm464_vm2, %v461_v28, 0.0 }
 0x1e9   : > { %v2596_v29 = vpop.permute.xlu1 %453  ;;  %v2600_v31 = vpop.permute.xlu0 %450 }
 0x1ea   : > { %v462_v32 = vmul.f32 %v2600_v31, %v2600_v31  ;;  %v463_v33 = vmul.f32 %v2596_v29, %v2596_v29 }
 0x1ec   : > { %523 = vrot.lane.b32.xlu1 %v461_v28, %s2285_s20  ;;  %521 = vrot.lane.b32.xlu0 %v460_v30, %s2285_s20  ;;  %v483_v56 = vsel %vm464_vm2, %v462_v32, 0.0  ;;  %v486_v57 = vsel %vm464_vm2, %v463_v33, 0.0 }
 0x1ed   : > { %v514_v34 = vpop.permute.xlu0 %513 }
 0x1ee   : > { %v537_v35 = vsel %vm464_vm2, %v514_v34, 0.0 }
 0x1f0   : > { %527 = vrot.lane.b32.xlu1 %v463_v33, %s2285_s20  ;;  %525 = vrot.lane.b32.xlu0 %v462_v32, %s2285_s20 }
 0x20f   : > { %538 = vadd.xlane.f32.xlu0 %v537_v35 }
 0x256   : > { %v516_v36 = vpop.permute.xlu1 %515 }
 0x257   : > { %v540_v37 = vsel %vm464_vm2, %v516_v36, 0.0 }
 0x258   : > { %541 = vadd.xlane.f32.xlu1 %v540_v37 }
 0x25a   : > { %v520_v38 = vpop.permute.xlu1 %519  ;;  %v518_v39 = vpop.permute.xlu0 %517 }
 0x25b   : > { %v543_v40 = vsel %vm464_vm2, %v518_v39, 0.0  ;;  %v546_v43 = vsel %vm464_vm2, %v520_v38, 0.0 }
 0x25c   : > { %544 = vadd.xlane.f32.xlu0 %v543_v40 }
 0x25e   : > { %v524_v41 = vpop.permute.xlu1 %523  ;;  %v522_v42 = vpop.permute.xlu0 %521 }
 0x25f   : > { %v549_v44 = vsel %vm464_vm2, %v522_v42, 0.0  ;;  %v552_v45 = vsel %vm464_vm2, %v524_v41, 0.0 }
 0x260   : > { %547 = vadd.xlane.f32.xlu0 %v546_v43  ;;  %550 = vadd.xlane.f32.xlu1 %v549_v44 }
 0x262   : > { %v526_v46 = vpop.permute.xlu0 %525  ;;  %v528_v48 = vpop.permute.xlu1 %527 }
 0x263   : > { %v555_v47 = vsel %vm464_vm2, %v526_v46, 0.0  ;;  %v558_v49 = vsel %vm464_vm2, %v528_v48, 0.0 }
 0x264   : > { %553 = vadd.xlane.f32.xlu0 %v552_v45  ;;  %556 = vadd.xlane.f32.xlu1 %v555_v47 }
 0x268   : > { %559 = vadd.xlane.f32.xlu0 %v558_v49  ;;  %466 = vadd.xlane.f32.xlu1 %v465_v50 }
 0x26c   : > { %469 = vadd.xlane.f32.xlu0 %v468_v51  ;;  %472 = vadd.xlane.f32.xlu1 %v471_v52 }
 0x270   : > { %475 = vadd.xlane.f32.xlu0 %v474_v53  ;;  %478 = vadd.xlane.f32.xlu1 %v477_v54 }
 0x274   : > { %481 = vadd.xlane.f32.xlu0 %v480_v55  ;;  %484 = vadd.xlane.f32.xlu1 %v483_v56 }
 0x278   : > { %487 = vadd.xlane.f32.xlu0 %v486_v57 }
 0x29c   : > { %v539_v58 = vpop.xlane.xlu0 %538 }
 0x29d   : > { %2013 = vrsqrt.f32 %v539_v58 }
 0x2a7   : > { %v2014_v59 = vpop.eup %2013 }
 0x2a8   : > { %v569_v60 = vmul.f32 %v2014_v59, %v2558_v16 }
 0x2aa   : > { %578 = vrot.lane.b32.xlu1 %v569_v60, %s2285_s20 }
 0x2e5   : > { %v542_v61 = vpop.xlane.xlu1 %541 }
 0x2e6   : > { %2015 = vrsqrt.f32 %v542_v61 }
 0x2e9   : > { %v545_v62 = vpop.xlane.xlu0 %544 }
 0x2ea   : > { %2017 = vrsqrt.f32 %v545_v62 }
 0x2ed   : > { %v551_v63 = vpop.xlane.xlu1 %550  ;;  %v548_v0 = vpop.xlane.xlu0 %547 }
 0x2ee   : > { %2019 = vrsqrt.f32 %v551_v63 }
 0x2ef   : > { %2021 = vrsqrt.f32 %v548_v0 }
 0x2f0   : > { %v2016_v2 = vpop.eup %2015 }
 0x2f1   : > { %v557_v3 = vpop.xlane.xlu1 %556  ;;  %v554_v4 = vpop.xlane.xlu0 %553  ;;  %v570_v5 = vmul.f32 %v2016_v2, %v2579_v22 }
 0x2f2   : > { %2023 = vrsqrt.f32 %v557_v3 }
 0x2f3   : > { %2025 = vrsqrt.f32 %v554_v4  ;;  %656 = vrot.lane.b32.xlu0 %v570_v5, %s2285_s20 }
 0x2f4   : > { %v2018_v6 = vpop.eup %2017 }
 0x2f5   : > { %v560_v7 = vpop.xlane.xlu0 %559  ;;  %v467_v8 = vpop.xlane.xlu1 %466  ;;  %v571_v9 = vmul.f32 %v2018_v6, %v2584_v24 }
 0x2f6   : > { %2027 = vrsqrt.f32 %v560_v7 }
 0x2f7   : > { %734 = vrot.lane.b32.xlu1 %v571_v9, %s2285_s20 }
 0x2f8   : > { %v2020_v10 = vpop.eup %2019 }
 0x2f9   : > { %v2022_v11 = vpop.eup %2021  ;;  %v473_v12 = vpop.xlane.xlu1 %472  ;;  %v573_v13 = vmul.f32 %v2020_v10, %v2564_v18 }
 0x2fa   : > { %v572_v15 = vmul.f32 %v2022_v11, %v2577_v21  ;;  %v470_v37 = vpop.xlane.xlu0 %469 }
 0x2fb   : > { %890 = vrot.lane.b32.xlu0 %v573_v13, %s2285_s20 }
 0x2fc   : > { %v2024_v17 = vpop.eup %2023  ;;  %812 = vrot.lane.b32.xlu1 %v572_v15, %s2285_s20 }
 0x2fd   : > { %v2026_v19 = vpop.eup %2025  ;;  %v479_v20 = vpop.xlane.xlu1 %478  ;;  %v575_v23 = vmul.f32 %v2024_v17, %v2600_v31 }
 0x2fe   : > { %v574_v26 = vmul.f32 %v2026_v19, %v2586_v25  ;;  %2029 = vrsqrt.f32 %v479_v20  ;;  %v476_v38 = vpop.xlane.xlu0 %475 }
 0x2ff   : > { %1046 = vrot.lane.b32.xlu0 %v575_v23, %s2285_s20  ;;  %2031 = vrsqrt.f32 %v467_v8 }
 0x300   : > { %v2028_v27 = vpop.eup %2027  ;;  %968 = vrot.lane.b32.xlu1 %v574_v26, %s2285_s20  ;;  %2033 = vrsqrt.f32 %v470_v37 }
 0x301   : > { %v576_v28 = vmul.f32 %v2028_v27, %v2596_v29  ;;  %v485_v33 = vpop.xlane.xlu1 %484  ;;  %2035 = vrsqrt.f32 %v473_v12 }
 0x302   : > { %v482_v39 = vpop.xlane.xlu0 %481  ;;  %2037 = vrsqrt.f32 %v476_v38 }
 0x303   : > { %2039 = vrsqrt.f32 %v485_v33 }
 0x304   : > { %1124 = vrot.lane.b32.xlu1 %v576_v28, %s2285_s20  ;;  %2041 = vrsqrt.f32 %v482_v39 }
 0x308   : > { %v2030_v30 = vpop.eup %2029 }
 0x309   : > { %v501_v32 = vmul.f32 %v2030_v30, %v2564_v18  ;;  %v2032_v34 = vpop.eup %2031  ;;  %v488_v18 = vpop.xlane.xlu0 %487 }
 0x30a   : > { %v497_v36 = vmul.f32 %v2032_v34, %v2558_v16  ;;  %v2034_v40 = vpop.eup %2033  ;;  %2043 = vrsqrt.f32 %v488_v18 }
 0x30b   : > { %v498_v42 = vmul.f32 %v2034_v40, %v2579_v22  ;;  %v2036_v43 = vpop.eup %2035 }
 0x30c   : > { %v499_v45 = vmul.f32 %v2036_v43, %v2584_v24  ;;  %v2038_v46 = vpop.eup %2037 }
 0x30d   : > { %v2040_v49 = vpop.eup %2039  ;;  %v500_v50 = vmul.f32 %v2038_v46, %v2577_v21 }
 0x30e   : > { %v2042_v51 = vpop.eup %2041  ;;  %v503_v54 = vmul.f32 %v2040_v49, %v2600_v31 }
 0x30f   : > { %v502_v55 = vmul.f32 %v2042_v51, %v2586_v25 }
 0x314   : > { %v2044_v56 = vpop.eup %2043 }
 0x315   : > { %v504_v25 = vmul.f32 %v2044_v56, %v2596_v29 }
 0x31c   : > { %v579_v35 = vpop.permute.xlu1 %578 }
 0x31d   : > { %1857 = vmatpush3.xpose.msk.msra.mxu0 %vm464_vm2, %v579_v35 }
 0x31e   : > { %1866 = vmatprep.subr.mxu0 %v2281_v1 }
 0x320   : > { %1859 = vmatmul.mubr.msk.f32.vlgmr.msra.gmra.mrb[2].mxu0 %vm464_vm2, %v497_v36 }
 0x321   : > { %1868 = vmatprep.mubr.msk.f32.mxu0 %vm2280_vm0, %v2281_v1 }
 0x365   : > { %v657_v41 = vpop.permute.xlu0 %656 }
 0x366   : > { %1862 = vmatpush3.xpose.msk.msra.mxu1 %vm464_vm2, %v657_v41 }
 0x367   : > { %1871 = vmatprep.subr.mxu1 %v2281_v1 }
 0x369   : > { %1864 = vmatmul.mubr.msk.f32.vlgmr.msra.gmra.mrb[2].mxu1 %vm464_vm2, %v498_v42  ;;  %v735_v44 = vpop.permute.xlu1 %734 }
 0x36a   : > { %1867 = vmatpush3.xpose.msk.msra.mxu0 %vm464_vm2, %v735_v44  ;;  %1873 = vmatprep.mubr.msk.f32.mxu1 %vm2280_vm0, %v2281_v1 }
 0x36b   : > { %1876 = vmatprep.subr.mxu0 %v2281_v1 }
 0x36d   : > { %v891_v47 = vpop.permute.xlu0 %890  ;;  %1869 = vmatmul.mubr.msk.f32.vlgmr.msra.gmra.mrb[4].mxu0 %vm464_vm2, %v499_v45 }
 0x36e   : > { %v813_v48 = vpop.permute.xlu1 %812  ;;  %1877 = vmatpush3.xpose.msk.msra.mxu0 %vm464_vm2, %v891_v47  ;;  %1878 = vmatprep.mubr.msk.f32.mxu0 %vm2280_vm0, %v2281_v1 }
 0x36f   : > { %1872 = vmatpush3.xpose.msk.msra.mxu1 %vm464_vm2, %v813_v48  ;;  %1886 = vmatprep.subr.mxu0 %v2281_v1 }
 0x370   : > { %1881 = vmatprep.subr.mxu1 %v2281_v1 }
 0x371   : > { %v1047_v52 = vpop.permute.xlu0 %1046  ;;  %1879 = vmatmul.mubr.msk.f32.vlgmr.msra.gmra.mrb[6].mxu0 %vm464_vm2, %v501_v32 }
 0x372   : > { %1874 = vmatmul.mubr.msk.f32.vlgmr.msra.gmra.mrb[4].mxu1 %vm464_vm2, %v500_v50  ;;  %v969_v53 = vpop.permute.xlu1 %968  ;;  %1887 = vmatpush3.xpose.msk.msra.mxu0 %vm464_vm2, %v1047_v52 }
 0x373   : > { %1882 = vmatpush3.xpose.msk.msra.mxu1 %vm464_vm2, %v969_v53  ;;  %1883 = vmatprep.mubr.msk.f32.mxu1 %vm2280_vm0, %v2281_v1 }
 0x374   : > { %1888 = vmatprep.mubr.msk.f32.mxu0 %vm2280_vm0, %v2281_v1  ;;  %1891 = vmatprep.subr.mxu1 %v2281_v1 }
 0x375   : > { %1889 = vmatmul.mubr.msk.f32.vlgmr.msra.gmra.mrb[8].mxu0 %vm464_vm2, %v503_v54  ;;  %1896 = vmatprep.subr.mxu0 %v2281_v1 }
 0x376   : > { %1884 = vmatmul.mubr.msk.f32.vlgmr.msra.gmra.mrb[6].mxu1 %vm464_vm2, %v502_v55  ;;  %v1125_v31 = vpop.permute.xlu1 %1124  ;;  %1898 = vmatprep.mubr.msk.f32.mxu0 %vm2280_vm0, %v2281_v1 }
 0x377   : > { %1892 = vmatpush3.xpose.msk.msra.mxu1 %vm464_vm2, %v1125_v31  ;;  %1893 = vmatprep.mubr.msk.f32.mxu1 %vm2280_vm0, %v2281_v1 }
 0x378   : > { %1901 = vmatprep.subr.mxu1 %v2281_v1 }
 0x37a   : > { %1894 = vmatmul.mubr.msk.f32.vlgmr.msra.gmra.mrb[8].mxu1 %vm464_vm2, %v504_v25 }
 0x37b   : > { %1903 = vmatprep.mubr.msk.f32.mxu1 %vm2280_vm0, %v2281_v1 }
 0x3f3   : > { %v651_v57 = vpop.f32.mrb[2].mxu0 }
 0x3f4   : > { %v1860_v58 = vpop.f32.mrb[3].mxu0  ;;  %v1201_v59 = vsel %vm464_vm2, %v651_v57, -inf }
 0x3f5   : > { %1202 = vmax.xlane.f32.xlu0 %v1201_v59 }
 0x43c   : > { %v729_v60 = vpop.f32.mrb[2].mxu1 }
 0x43d   : > { %v1865_v61 = vpop.f32.mrb[3].mxu1  ;;  %v1204_v62 = vsel %vm464_vm2, %v729_v60, -inf }
 0x43e   : > { %1205 = vmax.xlane.f32.xlu0 %v1204_v62 }
 0x440   : > { %v807_v63 = vpop.f32.mrb[4].mxu0 }
 0x441   : > { %v1870_v0 = vpop.f32.mrb[5].mxu0  ;;  %v1207_v9 = vsel %vm464_vm2, %v807_v63, -inf }
 0x444   : > { %v963_v29 = vpop.f32.mrb[6].mxu0 }
 0x445   : > { %v885_v2 = vpop.f32.mrb[4].mxu1  ;;  %v1880_v3 = vpop.f32.mrb[7].mxu0  ;;  %v1213_v4 = vsel %vm464_vm2, %v963_v29, -inf }
 0x446   : > { %v1875_v5 = vpop.f32.mrb[5].mxu1  ;;  %1214 = vmax.xlane.f32.xlu1 %v1213_v4  ;;  %v1210_v13 = vsel %vm464_vm2, %v885_v2, -inf }
 0x448   : > { %v1119_v6 = vpop.f32.mrb[8].mxu0 }
 0x449   : > { %v1041_v7 = vpop.f32.mrb[6].mxu1  ;;  %v1890_v8 = vpop.f32.mrb[9].mxu0  ;;  %v1219_v17 = vsel %vm464_vm2, %v1119_v6, -inf }
 0x44a   : > { %v1885_v10 = vpop.f32.mrb[7].mxu1  ;;  %v1216_v11 = vsel %vm464_vm2, %v1041_v7, -inf  ;;  %1208 = vmax.xlane.f32.xlu1 %v1207_v9 }
 0x44b   : > { %1217 = vmax.xlane.f32.xlu0 %v1216_v11 }
 0x44d   : > { %v1197_v12 = vpop.f32.mrb[8].mxu1 }
 0x44e   : > { %v1895_v15 = vpop.f32.mrb[9].mxu1  ;;  %1211 = vmax.xlane.f32.xlu1 %v1210_v13  ;;  %v1222_v19 = vsel %vm464_vm2, %v1197_v12, -inf }
 0x44f   : > { %1220 = vmax.xlane.f32.xlu0 %v1219_v17 }
 0x453   : > { %1223 = vmax.xlane.f32.xlu0 %v1222_v19 }
 0x45f   : > { %1297 = vrot.lane.b32.xlu1 %v2558_v16, %s2286_s11 }
 0x482   : > { %v1203_v20 = vpop.xlane.xlu0 %1202 }
 0x483   : > { %v1225_v23 = vsub.f32 %v651_v57, %v1203_v20 }
 0x485   : > { %v1233_v26 = vmul.f32 1.442695, %v1225_v23 }
 0x487   : > { %2045 = vpow2.f32 %v1233_v26 }
 0x491   : > { %v2700_v27 = vpop.eup %2045 }
 0x492   : > { %v1249_v28 = vsel %vm464_vm2, %v2700_v27, 0.0 }
 0x493   : > { %1250 = vadd.xlane.f32.xlu1 %v1249_v28 }
 0x4cb   : > { %v1206_v30 = vpop.xlane.xlu0 %1205 }
 0x4cc   : > { %v1226_v32 = vsub.f32 %v729_v60, %v1206_v30 }
 0x4ce   : > { %v1235_v33 = vmul.f32 1.442695, %v1226_v32 }
 0x4d0   : > { %2047 = vpow2.f32 %v1235_v33 }
 0x4d3   : > { %v1215_v34 = vpop.xlane.xlu1 %1214 }
 0x4d4   : > { %v1229_v35 = vsub.f32 %v963_v29, %v1215_v34 }
 0x4d6   : > { %v1241_v36 = vmul.f32 1.442695, %v1229_v35 }
 0x4d7   : > { %v1209_v37 = vpop.xlane.xlu1 %1208 }
 0x4d8   : > { %2049 = vpow2.f32 %v1241_v36  ;;  %v1218_v16 = vpop.xlane.xlu0 %1217  ;;  %v1227_v38 = vsub.f32 %v807_v63, %v1209_v37 }
 0x4d9   : > { %v1230_v39 = vsub.f32 %v1041_v7, %v1218_v16 }
 0x4da   : > { %v2704_v18 = vpop.eup %2047  ;;  %v1237_v40 = vmul.f32 1.442695, %v1227_v38 }
 0x4db   : > { %v1243_v41 = vmul.f32 1.442695, %v1230_v39  ;;  %v1212_v42 = vpop.xlane.xlu1 %1211  ;;  %v1252_v43 = vsel %vm464_vm2, %v2704_v18, 0.0 }
 0x4dc   : > { %2051 = vpow2.f32 %v1237_v40  ;;  %v1228_v44 = vsub.f32 %v885_v2, %v1212_v42  ;;  %v1221_v45 = vpop.xlane.xlu0 %1220  ;;  %1253 = vadd.xlane.f32.xlu1 %v1252_v43 }
 0x4dd   : > { %2053 = vpow2.f32 %v1243_v41  ;;  %v1231_v46 = vsub.f32 %v1119_v6, %v1221_v45 }
 0x4de   : > { %v1239_v47 = vmul.f32 1.442695, %v1228_v44 }
 0x4df   : > { %v1245_v48 = vmul.f32 1.442695, %v1231_v46  ;;  %v1298_v49 = vpop.permute.xlu1 %1297 }
 0x4e0   : > { %2055 = vpow2.f32 %v1239_v47  ;;  %v1224_v50 = vpop.xlane.xlu0 %1223  ;;  %1897 = vmatpush3.msra.mxu0 %v1298_v49 }
 0x4e1   : > { %2057 = vpow2.f32 %v1245_v48  ;;  %v1232_v51 = vsub.f32 %v1197_v12, %v1224_v50  ;;  %1906 = vmatprep.subr.mxu0 %v2281_v1 }
 0x4e2   : > { %v2050_v52 = vpop.eup %2049 }
 0x4e3   : > { %v1247_v53 = vmul.f32 1.442695, %v1232_v51  ;;  %v1261_v54 = vsel %vm464_vm2, %v2050_v52, 0.0 }
 0x4e4   : > { %1262 = vadd.xlane.f32.xlu0 %v1261_v54 }
 0x4e5   : > { %2059 = vpow2.f32 %v1247_v53 }
 0x4e6   : > { %v2052_v55 = vpop.eup %2051 }
 0x4e7   : > { %v2054_v56 = vpop.eup %2053  ;;  %v1255_v31 = vsel %vm464_vm2, %v2052_v55, 0.0 }
 0x4e8   : > { %1256 = vadd.xlane.f32.xlu1 %v1255_v31  ;;  %v1264_v25 = vsel %vm464_vm2, %v2054_v56, 0.0 }
 0x4e9   : > { %1265 = vadd.xlane.f32.xlu0 %v1264_v25 }
 0x4ea   : > { %v2056_v57 = vpop.eup %2055 }
 0x4eb   : > { %v2058_v58 = vpop.eup %2057  ;;  %v1258_v59 = vsel %vm464_vm2, %v2056_v57, 0.0 }
 0x4ec   : > { %1259 = vadd.xlane.f32.xlu1 %v1258_v59  ;;  %v1267_v60 = vsel %vm464_vm2, %v2058_v58, 0.0 }
 0x4ed   : > { %1268 = vadd.xlane.f32.xlu0 %v1267_v60 }
 0x4ef   : > { %v2060_v61 = vpop.eup %2059 }
 0x4f0   : > { %v1270_v62 = vsel %vm464_vm2, %v2060_v61, 0.0 }
 0x4f1   : > { %1271 = vadd.xlane.f32.xlu0 %v1270_v62 }
 0x4fd   : > { %1449 = vrot.lane.b32.xlu1 %v2584_v24, %s2286_s11 }
 0x501   : > { %1525 = vrot.lane.b32.xlu1 %v2577_v21, %s2286_s11 }
 0x505   : > { %1613 = vrot.lane.b32.xlu1 %v2547_v14, %s2284_s24 }
 0x507   : > { %1373 = vrot.lane.b32.xlu0 %v2579_v22, %s2286_s11 }
 0x50b   : > { %1603 = vrot.lane.b32.xlu0 %v2547_v14, %s2283_s12 }
 0x50f   : > { %1623 = vrot.lane.b32.xlu0 %v2547_v14, %s2282_s21  ;;  %s2199_s21 = scalar_lea.vmem %s2198_s7, 256 }
 0x510   : > { %p2201_p5 = scmp.lt.s32.totalorder %s2199_s21, %s2193_s5 }
 0x512   : > { %p2202_p3 = por %p2201_p5, %p2200_p4 }
 0x514   : > { %p2203_p7 = pnand %p2202_p3, %p2196_p10 }
 0x520   : > { %v1251_v63 = vpop.xlane.xlu1 %1250 }
 0x521   : > { %2061 = vrcp.f32 %v1251_v63 }
 0x52b   : > { %v2062_v2 = vpop.eup %2061 }
 0x52c   : > { %v1274_v5 = vmul.f32 %v2062_v2, %v2700_v27 }
 0x569   : > { %v1254_v0 = vpop.xlane.xlu1 %1253 }
 0x571   : > { %v1263_v29 = vpop.xlane.xlu0 %1262 }
 0x572   : > { %2063 = vrcp.f32 %v1263_v29 }
 0x573   : > { %2065 = vrcp.f32 %v1254_v0 }
 0x575   : > { %v1257_v24 = vpop.xlane.xlu1 %1256 }
 0x576   : > { %v1266_v21 = vpop.xlane.xlu0 %1265 }
 0x577   : > { %2067 = vrcp.f32 %v1266_v21 }
 0x578   : > { %2069 = vrcp.f32 %v1257_v24 }
 0x579   : > { %v1260_v3 = vpop.xlane.xlu1 %1259 }
 0x57a   : > { %v1269_v4 = vpop.xlane.xlu0 %1268 }
 0x57b   : > { %2071 = vrcp.f32 %v1269_v4 }
 0x57c   : > { %v2064_v22 = vpop.eup %2063  ;;  %2073 = vrcp.f32 %v1260_v3 }
 0x57d   : > { %v1282_v6 = vmul.f32 %v2064_v22, %v2050_v52  ;;  %v2066_v8 = vpop.eup %2065  ;;  %v1450_v15 = vpop.permute.xlu1 %1449 }
 0x57e   : > { %v1272_v7 = vpop.xlane.xlu0 %1271  ;;  %v1276_v12 = vmul.f32 %v2066_v8, %v2704_v18 }
 0x57f   : > { %2075 = vrcp.f32 %v1272_v7  ;;  %v1289_v9 = vadd.f32 %v1282_v6, %v1274_v5 }
 0x581   : > { %v2068_v10 = vpop.eup %2067  ;;  %v1293_v11 = vmul.f32 0.5, %v1289_v9  ;;  %v1526_v32 = vpop.permute.xlu1 %1525 }
 0x582   : > { %v1284_v13 = vmul.f32 %v2068_v10, %v2054_v56  ;;  %v1374_v17 = vpop.permute.xlu0 %1373  ;;  %v2070_v19 = vpop.eup %2069 }
 0x583   : > { %1902 = vmatpush3.msra.mxu1 %v1374_v17  ;;  %1899 = vmatmul.mubr.msk.f32.vlgmr.msra.gmra.mrb[10].mxu0 %vm464_vm2, %v1293_v11  ;;  %v1278_v26 = vmul.f32 %v2070_v19, %v2052_v55 }
 0x584   : > { %1907 = vmatpush3.msra.mxu0 %v1450_v15  ;;  %1911 = vmatprep.subr.mxu1 %v2281_v1  ;;  %v1290_v20 = vadd.f32 %v1284_v13, %v1276_v12 }
 0x585   : > { %v2072_v23 = vpop.eup %2071  ;;  %1908 = vmatprep.mubr.msk.f32.mxu0 %vm2280_vm0, %v2281_v1  ;;  %v1614_v44 = vpop.permute.xlu1 %1613 }
 0x586   : > { %v1286_v27 = vmul.f32 %v2072_v23, %v2058_v58  ;;  %v1294_v28 = vmul.f32 0.5, %v1290_v20  ;;  %v2074_v30 = vpop.eup %2073  ;;  %v1604_v41 = vpop.permute.xlu0 %1603 }
 0x587   : > { %v1280_v35 = vmul.f32 %v2074_v30, %v2056_v57 }
 0x588   : > { %1904 = vmatmul.mubr.msk.f32.vlgmr.msra.gmra.mrb[10].mxu1 %vm464_vm2, %v1294_v28  ;;  %v1291_v33 = vadd.f32 %v1286_v27, %v1278_v26 }
 0x589   : > { %v2076_v34 = vpop.eup %2075  ;;  %1912 = vmatpush3.msra.mxu1 %v1526_v32  ;;  %1913 = vmatprep.mubr.msk.f32.mxu1 %vm2280_vm0, %v2281_v1 }
 0x58a   : > { %v1288_v36 = vmul.f32 %v2076_v34, %v2060_v61  ;;  %v1295_v37 = vmul.f32 0.5, %v1291_v33 }
 0x58c   : > { %1909 = vmatmul.mubr.msk.f32.vlgmr.msra.gmra.mrb[12].mxu0 %vm464_vm2, %v1295_v37  ;;  %v1292_v16 = vadd.f32 %v1288_v36, %v1280_v35 }
 0x58e   : > { %v1296_v38 = vmul.f32 0.5, %v1292_v16 }
 0x590   : > { %1914 = vmatmul.mubr.msk.f32.vlgmr.msra.gmra.mrb[12].mxu1 %vm464_vm2, %v1296_v38 }
 0x656   : > { %v1369_v39 = vpop.f32.mrb[10].mxu0 }
 0x657   : > { %v1601_v18 = vadd.f32 %v1369_v39, %v2547_v14  ;;  %v1900_v40 = vpop.f32.mrb[11].mxu0  ;;  %v1624_v14 = vpop.permute.xlu0 %1623 }
 0x659   : > { %1602 = vst.msk [vmem:[%s2740_s25] sm:$0xff] %vm464_vm2, %v1601_v18 }
 0x65b   : > { %v1445_v1 = vpop.f32.mrb[10].mxu1 }
 0x65c   : > { %v1606_v42 = vadd.f32 %v1604_v41, %v1445_v1  ;;  %v1905_v43 = vpop.f32.mrb[11].mxu1 }
 0x65e   : > { %1608 = vrot.lane.b32.xlu1 %v1606_v42, %s2287_s2 }
 0x65f   : > { %v1521_v45 = vpop.f32.mrb[12].mxu0 }
 0x660   : > { %v1616_v46 = vadd.f32 %v1614_v44, %v1521_v45  ;;  %v1910_v47 = vpop.f32.mrb[13].mxu0 }
 0x662   : > { %1618 = vrot.lane.b32.xlu0 %v1616_v46, %s2288_s28 }
 0x663   : > { %v1597_v48 = vpop.f32.mrb[12].mxu1 }
 0x664   : > { %v1626_v49 = vadd.f32 %v1624_v14, %v1597_v48  ;;  %v1915_v50 = vpop.f32.mrb[13].mxu1 }
 0x666   : > { %1628 = vrot.lane.b32.xlu1 %v1626_v49, %s2289_s27 }
 0x6d0   : > { %v1609_v51 = vpop.permute.xlu1 %1608 }
 0x6d1   : > { %1612 = vst.msk [vmem:[%s2740_s25] sm:$0xff] %vm1611_vm3, %v1609_v51 }
 0x6d4   : > { %v1619_v52 = vpop.permute.xlu0 %1618 }
 0x6d5   : > { %1622 = vst.msk [vmem:[%s2740_s25] sm:$0xff] %vm1621_vm4, %v1619_v52 }
 0x6d8   : > { %v1629_v53 = vpop.permute.xlu1 %1628 }
 0x6d9   : > { %1632 = vst.msk [vmem:[%s2740_s25] sm:$0xff] %vm1631_vm5, %v1629_v53 }
 0x6da   : > { %2206 = shalt.err (!%p2203_p7)
}
 0x6db   : > { %s2207_s26 = scalar_lea.hbm %s2751_s6, 128  ;;  %s2211_s20 = scalar_lea.hbm %s2800_s4, 256 }
 0x6dc   : > { %p2208_p1 = scmp.ne.s32.totalorder %s2751_s6, %s2207_s26  ;;  %p2212_p0 = scmp.lt.u32.totalorder %s2751_s6, %s2800_s4 }
 0x6dd   : > { %p2213_p9 = scmp.lt.u32.totalorder %s2211_s20, %s2207_s26  ;;  %p2215_p2 = scmp.lt.u32.totalorder %s2207_s26, %s2751_s6 }
 0x6de   : > { %p2209_p8 = pnand %p2208_p1, %p2820_p13 }
 0x6df   : > { %p2214_p12 = por %p2213_p9, %p2212_p0 }
 0x6e0   : > { %p2210_p11 = pneg %p2209_p8 }
 0x6e1   : > { %p2216_p6 = por %p2215_p2, %p2214_p12 }
 0x6e3   : > { %p2217_p10 = pnand %p2216_p6, %p2210_p11 }
 0x6e5   : > { %2220 = shalt.err (!%p2217_p10)
}
 0x6e6   : > { %1940 = dma.vmem_to_hbm [thread:$0]  (%p2820_p13), %s2753_s8, 128, %s2751_s6, %s1634_s23  }
 0x6e7 PF: > { %s1659_s2 = sand.u32 1, %s2259_s15   ;;  %p2821_p4 = scmp.ne.s32.totalorder %s2807_s22, 0 }
 0x6e8   : > { %p2822_p5 = scmp.ge.s32.totalorder %s2271_s18, 2  ;;  %s1660_s28 = scalar_lea.sflag [#allocation4], %s1659_s2 }
 0x6ea   : > { %p1957_p3 = pnand %p2822_p5, %p2821_p4 }
 0x6ec   : > { %2254 = dma.done.wait (!%p1957_p3), %s1660_s28, 128  }
 0x6ed   : > { %2256 = vsyncadd (!%p1957_p3), %s1660_s28, 4294967168  ;;  %p21_p7 = scmp.ge.s32.totalorder %s2426_s9, 4   ;;  %s2823_s15 = smov %s2263_s16 }
 0x6ee   : > { %s2824_s16 = smov %s2267_s17  ;;  %s2825_s17 = smov %s2442_s14 }
 0x6ef   : > { %s2826_s18 = smov %s2426_s9  ;;  %23 = sbr.rel (!%p21_p7) target bundleno = 10 (0xa), region = 102 }
 0x6f6   :  { %1665 = vsyncpa [#allocation3], 1 }
 0x6f7   :  { %1667 = vsyncpa [#allocation3 + $0x1], 1 }
 0x6f8   :  { %1668 = vsyncpa [#allocation6], 1 }
 0x6f9   :  { %1670 = vsyncpa [#allocation6 + $0x1], 1 }
 0x6fa   :  { %1671 = vsyncpa [#allocation9], 1 }
 0x6fb   :  { %1672 = vsyncpa [#allocation4], 1 }
 0x6fc   :  { %1674 = vsyncpa [#allocation4 + $0x1], 1 }

</bundles_post_ra>
